<compile_context>
chip_gen: v6e
topology: v6e:2x2x1
jax: 0.10.0
libtpu: 0.0.40
codegen_flags: <defaults>
</compile_context>

<pallas_src>
import jax
import jax.numpy as jnp
from jax.experimental import pallas as pl
from jax.experimental.pallas import tpu as pltpu

D_IN, H1, H2, H3, D_OUT = 42, 32, 64, 128, 3
D_OUT_PAD = 128   # lane-dense output dim (3 -> 128, zero-padded weight/bias cols)


def _round_up(n, m):
    return (n + m - 1) // m * m


def _cdiv(a, b):
    return -(-a // b)


def mlp_kernel(x_ref, w1_ref, b1_ref, w2_ref, b2_ref, w3_ref, b3_ref,
               w4_ref, b4_ref, o_ref):
    # Fused 4-layer MLP on one (bt, 42) batch tile. Weights are VMEM-resident
    # (constant index_map); all dots accumulate in f32 on the MXU; bias-add and
    # ReLU run in f32 on the accumulator, then re-pack to the bf16 stream.
    cdt = w1_ref.dtype
    x = x_ref[...].astype(cdt)
    h = jnp.dot(x, w1_ref[...], preferred_element_type=jnp.float32) + b1_ref[...]
    h = jnp.maximum(h, 0.0).astype(cdt)
    h = jnp.dot(h, w2_ref[...], preferred_element_type=jnp.float32) + b2_ref[...]
    h = jnp.maximum(h, 0.0).astype(cdt)
    h = jnp.dot(h, w3_ref[...], preferred_element_type=jnp.float32) + b3_ref[...]
    h = jnp.maximum(h, 0.0).astype(cdt)
    out = jnp.dot(h, w4_ref[...], preferred_element_type=jnp.float32) + b4_ref[...]
    o_ref[...] = out.astype(o_ref.dtype)


def prepare_params(params, compute_dtype=jnp.bfloat16):
    """Cast weights to the compute dtype; pad W4/b4 cols (3 -> 128) with zeros.

    W1 stays unpadded (42, 32); biases stay f32 (added to the f32 accumulator)."""
    (w1, b1), (w2, b2), (w3, b3), (w4, b4) = params
    w4p = jnp.zeros((H3, D_OUT_PAD), compute_dtype).at[:, :D_OUT].set(
        w4.astype(compute_dtype))
    b4p = jnp.zeros((1, D_OUT_PAD), jnp.float32).at[:, :D_OUT].set(
        b4.astype(jnp.float32))
    return (w1.astype(compute_dtype), b1.astype(jnp.float32),
            w2.astype(compute_dtype), b2.astype(jnp.float32),
            w3.astype(compute_dtype), b3.astype(jnp.float32),
            w4p, b4p)


def mlp_forward(x, params, *, b_tile=1024, compute_dtype=jnp.bfloat16):
    B = x.shape[0]
    assert x.shape[1] == D_IN
    w1, b1, w2, b2, w3, b3, w4, b4 = prepare_params(params, compute_dtype)

    # Batch tile = MXU M dimension. Large for real batches, adaptively shrunk for
    # tiny batches (never below one 8-row sublane tile). For medium+ batches we
    # force >= 2 grid steps so the "parallel" axis can span both v7x TensorCores.
    B8 = _round_up(B, 8)
    n_tiles = 1 if B8 <= 8 else max(2, _cdiv(B8, b_tile))
    bt = _round_up(_cdiv(B8, n_tiles), 8)
    B_pad = _round_up(B8, bt)
    grid = (B_pad // bt,)

    def resident(shape):
        # Constant block index => stays VMEM-resident, no per-step re-DMA.
        return pl.BlockSpec(shape, lambda i: (0, 0))

    flops = 2 * B_pad * (D_IN * H1 + H1 * H2 + H2 * H3 + H3 * D_OUT)
    w_bytes = sum(int(a.size) * a.dtype.itemsize
                  for a in (w1, b1, w2, b2, w3, b3, w4, b4))
    bytes_accessed = (int(x.size) * x.dtype.itemsize      # raw f32 input stream
                      + B_pad * D_OUT_PAD * 2             # bf16 output stream
                      + w_bytes)

    out = pl.pallas_call(
        mlp_kernel,
        out_shape=jax.ShapeDtypeStruct((B_pad, D_OUT_PAD), jnp.bfloat16),
        grid=grid,
        in_specs=[
            # x streams raw: (bt, 42); last dim == full array dim is legal.
            pl.BlockSpec((bt, D_IN), lambda i: (i, 0)),
            resident(w1.shape), resident(b1.shape),
            resident(w2.shape), resident(b2.shape),
            resident(w3.shape), resident(b3.shape),
            resident(w4.shape), resident(b4.shape),
        ],
        out_specs=pl.BlockSpec((bt, D_OUT_PAD), lambda i: (i, 0)),
        compiler_params=pltpu.CompilerParams(
            dimension_semantics=("parallel",),
            vmem_limit_bytes=32 * 1024 * 1024),
        cost_estimate=pl.CostEstimate(
            flops=flops, transcendentals=0, bytes_accessed=bytes_accessed),
    )(x, w1, b1, w2, b2, w3, b3, w4, b4)

    return out[:B, :D_OUT].astype(jnp.float32)


def init_params(key):
    # Deterministic init mirroring nn.Linear shapes (stored transposed: (in, out)).
    dims = [(D_IN, H1), (H1, H2), (H2, H3), (H3, D_OUT)]
    params = []
    for (fan_in, fan_out) in dims:
        key, kw, kb = jax.random.split(key, 3)
        bound = 1.0 / jnp.sqrt(fan_in)
        w = jax.random.uniform(kw, (fan_in, fan_out), jnp.float32, -bound, bound)
        b = jax.random.uniform(kb, (1, fan_out), jnp.float32, -bound, bound)
        params.append((w, b))
    return params


def mlp_reference(x, params):
    h = x
    for i, (w, b) in enumerate(params):
        h = h @ w + b
        if i < len(params) - 1:
            h = jnp.maximum(h, 0.0)
    return h


if __name__ == "__main__":
    key = jax.random.PRNGKey(0)
    key, kx = jax.random.split(key)
    B = 8
    x = jax.random.normal(kx, (B, D_IN), jnp.float32)   # batch=8, features=42
    params = init_params(key)

    fwd = jax.jit(mlp_forward)
    out = jax.block_until_ready(fwd(x, params))
    ref = mlp_reference(x, params)

    assert out.shape == (B, D_OUT)
    # bf16 weight/activation/output stream (f32 accumulation) vs f32 reference.
    assert jnp.allclose(out, ref, atol=5e-2, rtol=5e-2), \
        float(jnp.max(jnp.abs(out - ref)))
    print("KERNEL_OK")
</pallas_src>

<mosaic_0001>
module attributes {stable_mosaic.version = 11 : i64} {
  func.func @mlp_kernel(%arg0: i32, %arg1: memref<8x42xf32, #tpu.memory_space<vmem>>, %arg2: memref<42x32xbf16, #tpu.memory_space<vmem>>, %arg3: memref<1x32xf32, #tpu.memory_space<vmem>>, %arg4: memref<32x64xbf16, #tpu.memory_space<vmem>>, %arg5: memref<1x64xf32, #tpu.memory_space<vmem>>, %arg6: memref<64x128xbf16, #tpu.memory_space<vmem>>, %arg7: memref<1x128xf32, #tpu.memory_space<vmem>>, %arg8: memref<128x128xbf16, #tpu.memory_space<vmem>>, %arg9: memref<1x128xf32, #tpu.memory_space<vmem>>, %arg10: memref<8x128xbf16, #tpu.memory_space<vmem>>) attributes {dimension_semantics = [#tpu.dimension_semantics<parallel>], iteration_bounds = array<i64: 1>, scalar_prefetch = 0 : i64, scratch_operands = 0 : i64, tpu.core_type = #tpu.core_type<tc>, window_params = [{transform_indices = @transform_0, window_bounds = array<i64: 8, 42>}, {pipeline_mode = #tpu.pipeline_mode<synchronous>, transform_indices = @transform_1, window_bounds = array<i64: 42, 32>}, {pipeline_mode = #tpu.pipeline_mode<synchronous>, transform_indices = @transform_2, window_bounds = array<i64: 1, 32>}, {pipeline_mode = #tpu.pipeline_mode<synchronous>, transform_indices = @transform_3, window_bounds = array<i64: 32, 64>}, {pipeline_mode = #tpu.pipeline_mode<synchronous>, transform_indices = @transform_4, window_bounds = array<i64: 1, 64>}, {pipeline_mode = #tpu.pipeline_mode<synchronous>, transform_indices = @transform_5, window_bounds = array<i64: 64, 128>}, {pipeline_mode = #tpu.pipeline_mode<synchronous>, transform_indices = @transform_6, window_bounds = array<i64: 1, 128>}, {pipeline_mode = #tpu.pipeline_mode<synchronous>, transform_indices = @transform_7, window_bounds = array<i64: 128, 128>}, {pipeline_mode = #tpu.pipeline_mode<synchronous>, transform_indices = @transform_8, window_bounds = array<i64: 1, 128>}, {transform_indices = @transform_9, window_bounds = array<i64: 8, 128>}]} {
    %c0 = arith.constant 0 : index
    %c0_0 = arith.constant 0 : index
    %0 = vector.load %arg1[%c0, %c0_0] : memref<8x42xf32, #tpu.memory_space<vmem>>, vector<8x42xf32>
    %1 = arith.truncf %0 : vector<8x42xf32> to vector<8x42xbf16>
    %c0_1 = arith.constant 0 : index
    %c0_2 = arith.constant 0 : index
    %2 = vector.load %arg2[%c0_1, %c0_2] : memref<42x32xbf16, #tpu.memory_space<vmem>>, vector<42x32xbf16>
    %cst = arith.constant dense<0.000000e+00> : vector<8x32xf32>
    %3 = tpu.matmul %1, %2, %cst {dimension_numbers = #tpu.dot_dimension_numbers<[1], [0], [0], [1], [0, 0, 1, 1], [], []>} : vector<8x42xbf16>, vector<42x32xbf16>, vector<8x32xf32> -> vector<8x32xf32>
    %c0_3 = arith.constant 0 : index
    %c0_4 = arith.constant 0 : index
    %4 = vector.load %arg3[%c0_3, %c0_4] : memref<1x32xf32, #tpu.memory_space<vmem>>, vector<1x32xf32>
    %5 = vector.broadcast %4 : vector<1x32xf32> to vector<8x32xf32>
    %6 = arith.addf %3, %5 : vector<8x32xf32>
    %cst_5 = arith.constant 0.000000e+00 : f32
    %7 = vector.broadcast %cst_5 : f32 to vector<8x32xf32>
    %8 = arith.maximumf %6, %7 : vector<8x32xf32>
    %9 = arith.truncf %8 : vector<8x32xf32> to vector<8x32xbf16>
    %c0_6 = arith.constant 0 : index
    %c0_7 = arith.constant 0 : index
    %10 = vector.load %arg4[%c0_6, %c0_7] : memref<32x64xbf16, #tpu.memory_space<vmem>>, vector<32x64xbf16>
    %cst_8 = arith.constant dense<0.000000e+00> : vector<8x64xf32>
    %11 = tpu.matmul %9, %10, %cst_8 {dimension_numbers = #tpu.dot_dimension_numbers<[1], [0], [0], [1], [0, 0, 1, 1], [], []>} : vector<8x32xbf16>, vector<32x64xbf16>, vector<8x64xf32> -> vector<8x64xf32>
    %c0_9 = arith.constant 0 : index
    %c0_10 = arith.constant 0 : index
    %12 = vector.load %arg5[%c0_9, %c0_10] : memref<1x64xf32, #tpu.memory_space<vmem>>, vector<1x64xf32>
    %13 = vector.broadcast %12 : vector<1x64xf32> to vector<8x64xf32>
    %14 = arith.addf %11, %13 : vector<8x64xf32>
    %cst_11 = arith.constant 0.000000e+00 : f32
    %15 = vector.broadcast %cst_11 : f32 to vector<8x64xf32>
    %16 = arith.maximumf %14, %15 : vector<8x64xf32>
    %17 = arith.truncf %16 : vector<8x64xf32> to vector<8x64xbf16>
    %c0_12 = arith.constant 0 : index
    %c0_13 = arith.constant 0 : index
    %18 = vector.load %arg6[%c0_12, %c0_13] : memref<64x128xbf16, #tpu.memory_space<vmem>>, vector<64x128xbf16>
    %cst_14 = arith.constant dense<0.000000e+00> : vector<8x128xf32>
    %19 = tpu.matmul %17, %18, %cst_14 {dimension_numbers = #tpu.dot_dimension_numbers<[1], [0], [0], [1], [0, 0, 1, 1], [], []>} : vector<8x64xbf16>, vector<64x128xbf16>, vector<8x128xf32> -> vector<8x128xf32>
    %c0_15 = arith.constant 0 : index
    %c0_16 = arith.constant 0 : index
    %20 = vector.load %arg7[%c0_15, %c0_16] : memref<1x128xf32, #tpu.memory_space<vmem>>, vector<1x128xf32>
    %21 = vector.broadcast %20 : vector<1x128xf32> to vector<8x128xf32>
    %22 = arith.addf %19, %21 : vector<8x128xf32>
    %cst_17 = arith.constant 0.000000e+00 : f32
    %23 = vector.broadcast %cst_17 : f32 to vector<8x128xf32>
    %24 = arith.maximumf %22, %23 : vector<8x128xf32>
    %25 = arith.truncf %24 : vector<8x128xf32> to vector<8x128xbf16>
    %c0_18 = arith.constant 0 : index
    %c0_19 = arith.constant 0 : index
    %26 = vector.load %arg8[%c0_18, %c0_19] : memref<128x128xbf16, #tpu.memory_space<vmem>>, vector<128x128xbf16>
    %cst_20 = arith.constant dense<0.000000e+00> : vector<8x128xf32>
    %27 = tpu.matmul %25, %26, %cst_20 {dimension_numbers = #tpu.dot_dimension_numbers<[1], [0], [0], [1], [0, 0, 1, 1], [], []>} : vector<8x128xbf16>, vector<128x128xbf16>, vector<8x128xf32> -> vector<8x128xf32>
    %c0_21 = arith.constant 0 : index
    %c0_22 = arith.constant 0 : index
    %28 = vector.load %arg9[%c0_21, %c0_22] : memref<1x128xf32, #tpu.memory_space<vmem>>, vector<1x128xf32>
    %29 = vector.broadcast %28 : vector<1x128xf32> to vector<8x128xf32>
    %30 = arith.addf %27, %29 : vector<8x128xf32>
    %31 = arith.truncf %30 : vector<8x128xf32> to vector<8x128xbf16>
    %c0_23 = arith.constant 0 : index
    %c0_24 = arith.constant 0 : index
    %32 = vector.load %arg10[%c0_23, %c0_24] : memref<8x128xbf16, #tpu.memory_space<vmem>>, vector<8x128xbf16>
    tpu.vector_store %arg10[%c0_23, %c0_24], %31 {strides = array<i32>} : memref<8x128xbf16, #tpu.memory_space<vmem>>, vector<8x128xbf16>,
    return
  }
  func.func @transform_0(%arg0: i32) -> (i32, i32) {
    %c0_i32 = arith.constant 0 : i32
    %c0_i32_0 = arith.constant 0 : i32
    return %arg0, %c0_i32 : i32, i32
  }
  func.func @transform_1(%arg0: i32) -> (i32, i32) {
    %c0_i32 = arith.constant 0 : i32
    %c0_i32_0 = arith.constant 0 : i32
    %c0_i32_1 = arith.constant 0 : i32
    return %c0_i32, %c0_i32_0 : i32, i32
  }
  func.func @transform_2(%arg0: i32) -> (i32, i32) {
    %c0_i32 = arith.constant 0 : i32
    %c0_i32_0 = arith.constant 0 : i32
    %c0_i32_1 = arith.constant 0 : i32
    return %c0_i32, %c0_i32_0 : i32, i32
  }
  func.func @transform_3(%arg0: i32) -> (i32, i32) {
    %c0_i32 = arith.constant 0 : i32
    %c0_i32_0 = arith.constant 0 : i32
    %c0_i32_1 = arith.constant 0 : i32
    return %c0_i32, %c0_i32_0 : i32, i32
  }
  func.func @transform_4(%arg0: i32) -> (i32, i32) {
    %c0_i32 = arith.constant 0 : i32
    %c0_i32_0 = arith.constant 0 : i32
    %c0_i32_1 = arith.constant 0 : i32
    return %c0_i32, %c0_i32_0 : i32, i32
  }
  func.func @transform_5(%arg0: i32) -> (i32, i32) {
    %c0_i32 = arith.constant 0 : i32
    %c0_i32_0 = arith.constant 0 : i32
    %c0_i32_1 = arith.constant 0 : i32
    return %c0_i32, %c0_i32_0 : i32, i32
  }
  func.func @transform_6(%arg0: i32) -> (i32, i32) {
    %c0_i32 = arith.constant 0 : i32
    %c0_i32_0 = arith.constant 0 : i32
    %c0_i32_1 = arith.constant 0 : i32
    return %c0_i32, %c0_i32_0 : i32, i32
  }
  func.func @transform_7(%arg0: i32) -> (i32, i32) {
    %c0_i32 = arith.constant 0 : i32
    %c0_i32_0 = arith.constant 0 : i32
    %c0_i32_1 = arith.constant 0 : i32
    return %c0_i32, %c0_i32_0 : i32, i32
  }
  func.func @transform_8(%arg0: i32) -> (i32, i32) {
    %c0_i32 = arith.constant 0 : i32
    %c0_i32_0 = arith.constant 0 : i32
    %c0_i32_1 = arith.constant 0 : i32
    return %c0_i32, %c0_i32_0 : i32, i32
  }
  func.func @transform_9(%arg0: i32) -> (i32, i32) {
    %c0_i32 = arith.constant 0 : i32
    %c0_i32_0 = arith.constant 0 : i32
    return %arg0, %c0_i32 : i32, i32
  }
}

</mosaic_0001>

<bundles_post_ra>
// kernel: mlp_forward.1
= control target key start
LH: loop header
LB: loop body
LE: loop exit
PB: predicated region body
PF: predicated region fallthrough
CT: control target
= control target key end

     0   :  { %vm69_vm0 = vcmask 1044480   ;;  %v500_v0 = vmov 0.0   ;;  %vm501_vm1 = vmmov 0   ;;  %vm65_vm2 = vcmask 343040   ;;  %s646_s1 = inlined_call_operand.vmem [shape: bf16[42,32], index: 1, kind: input, shape index: {}]   ;;  %s647_s3 = inlined_call_operand.vmem [shape: bf16[32,64], index: 3, kind: input, shape index: {}]   ;;  %s648_s0 = inlined_call_operand.vmem [shape: f32[8,42], index: 0, kind: input, shape index: {}]   ;;  %s649_s5 = inlined_call_operand.vmem [shape: bf16[64,128], index: 5, kind: input, shape index: {}]   ;;  %s650_s2 = inlined_call_operand.vmem [shape: f32[1,32], index: 2, kind: input, shape index: {}]   ;;  %s651_s7 = inlined_call_operand.vmem [shape: bf16[128,128], index: 7, kind: input, shape index: {}]   ;;  %s652_s4 = inlined_call_operand.vmem [shape: f32[1,64], index: 4, kind: input, shape index: {}]   ;;  %s653_s6 = inlined_call_operand.vmem [shape: f32[1,128], index: 6, kind: input, shape index: {}]   ;;  %s654_s8 = inlined_call_operand.vmem [shape: f32[1,128], index: 8, kind: input, shape index: {}]   ;;  %s655_s9 = inlined_call_operand.vmem [shape: bf16[8,128], index: 9, kind: output, shape index: {}]  }
   0x1   :  { %431 = vmatprep.subr.bf16.mxu1 %v500_v0  ;;  %v483_v1 = vld [vmem:[%s646_s1 + $0x10] sm:$0x1f]   ;;  %437 = vmatprep.mubr.msk.bf16.mxu1 %vm501_vm1, %v500_v0  ;;  %v484_v3 = vld [vmem:[%s646_s1 + $0x8] sm:$0xff]   ;;  %v485_v4 = vld [vmem:[%s646_s1] sm:$0xff]   ;;  %vm138_vm3 = vcmask 261120   ;;  %vm223_vm4 = vcmask 523264  }
   0x2   :  { %461 = vmatprep.subr.bf16.mxu0 %v500_v0  ;;  %477 = vmatprep.mubr.msk.bf16.mxu0 %vm501_vm1, %v500_v0  ;;  %v71_v2 = vsel %vm69_vm0, %v483_v1, 0  ;;  %v33_v5 = vld [vmem:[%s648_s0] sm:$0xff]  ;;  %v486_v7 = vld [vmem:[%s647_s3 + $0x8] sm:$0xff]   ;;  %v488_v15 = vld [vmem:[%s649_s5 + $0x18] sm:$0xff]  }
   0x3   :  { %432 = vmatpush3.bf16.msra.mxu1 %v71_v2  ;;  %v34_v6 = vpack.c.bf16 %v33_v5, %v33_v5  ;;  %v487_v8 = vld [vmem:[%s647_s3] sm:$0xff]   ;;  %v489_v18 = vld [vmem:[%s649_s5 + $0x10] sm:$0xff]   ;;  %v490_v19 = vld [vmem:[%s649_s5 + $0x8] sm:$0xff]  }
   0x4   :  { %433 = vmatprep.subr.bf16.mxu1 %v500_v0  ;;  %v386_v9 = vld [vmem:[%s650_s2] ss:$0 sm:$0xff]  ;;  %v492_v21 = vld [vmem:[%s651_s7 + $0x38] sm:$0xff]   ;;  %v493_v22 = vld [vmem:[%s651_s7 + $0x30] sm:$0xff]  }
   0x5   :  { %v491_v20 = vld [vmem:[%s649_s5] sm:$0xff]   ;;  %462 = vmatpush3.bf16.msra.mxu0 %v492_v21  ;;  %v494_v23 = vld [vmem:[%s651_s7 + $0x28] sm:$0xff]   ;;  %v496_v25 = vld [vmem:[%s651_s7 + $0x18] sm:$0xff]  }
   0x6   :  { %463 = vmatprep.subr.bf16.mxu0 %v500_v0  ;;  %v495_v24 = vld [vmem:[%s651_s7 + $0x20] sm:$0xff]   ;;  %v497_v26 = vld [vmem:[%s651_s7 + $0x10] sm:$0xff]   ;;  %v498_v35 = vld [vmem:[%s651_s7 + $0x8] sm:$0xff]  }
   0x7   :  { %434 = vmatpush3.bf16.msra.mxu1 %v484_v3  ;;  %v391_v27 = vld [vmem:[%s652_s4] ss:$0 sm:$0xff] }
   0x8   :  { %435 = vmatprep.subr.bf16.mxu1 %v500_v0  ;;  %v499_v36 = vld [vmem:[%s651_s7] sm:$0xff]  }
   0x9   :  { %464 = vmatpush3.bf16.msra.mxu0 %v493_v22  ;;  %v395_v37 = vld [vmem:[%s653_s6] ss:$0 sm:$0xff] }
   0xa   :  { %465 = vmatprep.subr.bf16.mxu0 %v500_v0  ;;  %v401_v45 = vld [vmem:[%s654_s8] ss:$0 sm:$0xff] }
   0xb   :  { %436 = vmatpush3.bf16.msra.mxu1 %v485_v4 }
   0xc   :  { %441 = vmatprep.subr.bf16.mxu1 %v500_v0 }
   0xd   :  { %466 = vmatpush3.bf16.msra.mxu0 %v494_v23 }
   0xe   :  { %438 = vmatmul.mubr.msk.bf16.vlgmr.msra.gmra.mxu1 %vm65_vm2, %v34_v6  ;;  %467 = vmatprep.subr.bf16.mxu0 %v500_v0 }
   0xf   :  { %442 = vmatpush3.bf16.msra.mxu1 %v486_v7  ;;  %445 = vmatprep.mubr.msk.bf16.mxu1 %vm501_vm1, %v500_v0 }
  0x10   :  { %443 = vmatprep.subr.bf16.mxu1 %v500_v0 }
  0x11   :  { %468 = vmatpush3.bf16.msra.mxu0 %v495_v24 }
  0x12   :  { %469 = vmatprep.subr.bf16.mxu0 %v500_v0 }
  0x13   :  { %444 = vmatpush3.bf16.msra.mxu1 %v487_v8 }
  0x14   :  { %449 = vmatprep.subr.bf16.mxu1 %v500_v0 }
  0x15   :  { %470 = vmatpush3.bf16.msra.mxu0 %v496_v25 }
  0x16   :  { %471 = vmatprep.subr.bf16.mxu0 %v500_v0 }
  0x19   :  { %472 = vmatpush3.bf16.msra.mxu0 %v497_v26 }
  0x1a   :  { %473 = vmatprep.subr.bf16.mxu0 %v500_v0 }
  0x1d   :  { %474 = vmatpush3.bf16.msra.mxu0 %v498_v35 }
  0x1e   :  { %475 = vmatprep.subr.bf16.mxu0 %v500_v0 }
  0x21   :  { %476 = vmatpush3.bf16.msra.mxu0 %v499_v36 }
  0xce   :  { %v107_v10 = vpop.f32.mrf.mxu1 }
  0xcf   :  { %v108_v11 = vadd.f32 %v386_v9, %v107_v10 }
  0xd0   :  { %v439_v12 = vpop.f32.mrf.mxu1 }
  0xd1   :  { %v113_v13 = vmax.f32 %v108_v11, 0.0 }
  0xd2   :  { %v110_v14 = vpop.f32.mrf.mxu1 }
  0xd3   :  { %v114_v16 = vpack.c.bf16 %v113_v13, %v113_v13 }
  0xd4   :  { %v440_v17 = vpop.f32.mrf.mxu1 }
  0xd5   :  { %446 = vmatmul.mubr.msk.bf16.vlgmr.msra.gmra.mxu1 %vm138_vm3, %v114_v16 }
  0xd6   :  { %450 = vmatpush3.bf16.msra.mxu1 %v488_v15  ;;  %457 = vmatprep.mubr.msk.bf16.mxu1 %vm501_vm1, %v500_v0 }
  0xd7   :  { %451 = vmatprep.subr.bf16.mxu1 %v500_v0 }
  0xda   :  { %452 = vmatpush3.bf16.msra.mxu1 %v489_v18 }
  0xdb   :  { %453 = vmatprep.subr.bf16.mxu1 %v500_v0 }
  0xde   :  { %454 = vmatpush3.bf16.msra.mxu1 %v490_v19 }
  0xdf   :  { %455 = vmatprep.subr.bf16.mxu1 %v500_v0 }
  0xe2   :  { %456 = vmatpush3.bf16.msra.mxu1 %v491_v20 }
 0x195   :  { %v176_v28 = vpop.f32.mrf.mxu1 }
 0x196   :  { %v177_v29 = vadd.f32 %v391_v27, %v176_v28 }
 0x197   :  { %v447_v30 = vpop.f32.mrf.mxu1 }
 0x198   :  { %v182_v31 = vmax.f32 %v177_v29, 0.0 }
 0x199   :  { %v179_v32 = vpop.f32.mrf.mxu1 }
 0x19a   :  { %v183_v33 = vpack.c.bf16 %v182_v31, %v182_v31 }
 0x19b   :  { %v448_v34 = vpop.f32.mrf.mxu1 }
 0x19c   :  { %458 = vmatmul.mubr.msk.bf16.vlgmr.msra.gmra.mxu1 %vm223_vm4, %v183_v33 }
 0x25c   :  { %v261_v38 = vpop.f32.mrf.mxu1 }
 0x25d   :  { %v262_v39 = vadd.f32 %v395_v37, %v261_v38 }
 0x25e   :  { %v459_v40 = vpop.f32.mrf.mxu1 }
 0x25f   :  { %v267_v41 = vmax.f32 %v262_v39, 0.0 }
 0x260   :  { %v264_v42 = vpop.f32.mrf.mxu1 }
 0x261   :  { %v268_v43 = vpack.c.bf16 %v267_v41, %v267_v41 }
 0x262   :  { %v460_v44 = vpop.f32.mrf.mxu1 }
 0x263   :  { %478 = vmatmul.mubr.bf16.vlgmr.msra.gmra.mxu0 %v268_v43 }
 0x323   :  { %v374_v46 = vpop.f32.mrf.mxu0 }
 0x324   :  { %v375_v47 = vadd.f32 %v401_v45, %v374_v46 }
 0x325   :  { %v479_v48 = vpop.f32.mrf.mxu0 }
 0x326   :  { %v380_v49 = vpack.c.bf16 %v375_v47, %v375_v47 }
 0x327   :  { %v377_v50 = vpop.f32.mrf.mxu0 }
 0x328   :  { %381 = vst [vmem:[%s655_s9] sm:$0xf] %v380_v49 }
 0x329   :  { %v480_v51 = vpop.f32.mrf.mxu0 }

</bundles_post_ra>
